<compile_context>
chip_gen: v6e
topology: v6e:2x2x1
jax: 0.10.0
libtpu: 0.0.40
codegen_flags: <defaults>
</compile_context>

<pallas_src>
import jax
import jax.numpy as jnp
from jax.experimental import pallas as pl
from jax.experimental.pallas import tpu as pltpu


def _attention_kernel(lo_ref, w_ref, b_ref, ctx_ref, attw_ref):
    lo = lo_ref[...]                                   # (bb, T, D)  f32
    w = w_ref[...]                                     # (1, 1, D)
    b = b_ref[0]                                       # scalar bias from SMEM

    # attention scores, lane-dense (bb, T): VPU multiply + XLU lane reduce over D
    scores = jnp.sum(lo * w, axis=-1) + b              # (bb, T)

    # softmax over time (last / lane axis), numerically stabilised
    m = jnp.max(scores, axis=-1, keepdims=True)        # (bb, 1)
    e = jnp.exp(scores - m)                            # (bb, T)
    attn = e / jnp.sum(e, axis=-1, keepdims=True)      # (bb, T)

    # context vector: weighted sum over time -> (bb, D) (VPU + sublane reduce)
    ctx = jnp.sum(attn[:, :, None] * lo, axis=1)       # (bb, D)

    ctx_ref[...] = ctx.astype(ctx_ref.dtype)
    attw_ref[...] = attn.astype(attw_ref.dtype)


def _choose_block_b(B, T, D, itemsize=4, target_bytes=6 << 20):
    """Pick a batch tile that fills a few MiB of VMEM and stays layout-friendly."""
    per_row = max(1, T * D * itemsize)
    bb = min(B, max(1, target_bytes // per_row))
    if bb < B:
        # keep the batch tile a multiple of 8 (sublane alignment of 2-D outputs)
        bb = min(B, max(8, (bb // 8) * 8))
    # v7x has 2 TensorCores: prefer >=2 parallel grid steps when we can keep
    # the 8-row alignment of the smaller tile.
    if bb == B and B >= 16 and (B // 2) % 8 == 0:
        bb = B // 2
    return bb


def attention_layer(lstm_output, w_att, b_att):
    """Pallas forward of AttentionLayer.

    lstm_output: (B, T, D) float32
    w_att:       (D,)   attention Linear weight (PyTorch stores it as (1, D))
    b_att:       (1,)   attention Linear bias
    Returns (context_vector (B, D), attention_weights (B, T, 1)).
    """
    B, T, D = lstm_output.shape
    block_b = _choose_block_b(B, T, D, lstm_output.dtype.itemsize)
    grid = (pl.cdiv(B, block_b),)

    ctx, attw = pl.pallas_call(
        _attention_kernel,
        out_shape=(
            jax.ShapeDtypeStruct((B, D), jnp.float32),
            jax.ShapeDtypeStruct((B, T), jnp.float32),   # lane-dense weights
        ),
        grid=grid,
        in_specs=[
            pl.BlockSpec((block_b, T, D), lambda i: (i, 0, 0)),
            pl.BlockSpec((1, 1, D), lambda i: (0, 0, 0)),
            pl.BlockSpec(memory_space=pltpu.MemorySpace.SMEM),   # scalar bias
        ],
        out_specs=(
            pl.BlockSpec((block_b, D), lambda i: (i, 0)),
            pl.BlockSpec((block_b, T), lambda i: (i, 0)),
        ),
        compiler_params=pltpu.CompilerParams(
            dimension_semantics=("parallel",),
            vmem_limit_bytes=48 << 20,   # fits v7x's 64 MiB, unlocks big tiles on v5e/v6e
        ),
    )(lstm_output, w_att.reshape(1, 1, D), b_att.reshape(1))

    # Re-add the trailing singleton dim to match the PyTorch output shape.
    return ctx, attw[:, :, None]


if __name__ == "__main__":
    BATCH, SEQ, HIDDEN = 2, 16, 128   # lstm_output feature dim (e.g. 2*64 from a BiLSTM)

    key = jax.random.PRNGKey(0)
    k_x, k_w, k_b = jax.random.split(key, 3)
    lstm_out = jax.random.normal(k_x, (BATCH, SEQ, HIDDEN), jnp.float32)
    bound = 1.0 / (HIDDEN ** 0.5)     # PyTorch nn.Linear default init range
    w_att = jax.random.uniform(k_w, (HIDDEN,), jnp.float32, -bound, bound)
    b_att = jax.random.uniform(k_b, (1,), jnp.float32, -bound, bound)

    ctx, attw = jax.block_until_ready(attention_layer(lstm_out, w_att, b_att))

    assert ctx.shape == (BATCH, HIDDEN), ctx.shape
    assert attw.shape == (BATCH, SEQ, 1), attw.shape
    assert bool(jnp.all(jnp.isfinite(ctx))) and bool(jnp.all(jnp.isfinite(attw)))

    # plain-JAX reference (matches the PyTorch forward)
    scores_ref = jnp.einsum("btd,do->bto", lstm_out, w_att.reshape(HIDDEN, 1),
                            precision=jax.lax.Precision.HIGHEST) + b_att
    attw_ref = jax.nn.softmax(scores_ref, axis=1)
    ctx_ref = jnp.sum(attw_ref * lstm_out, axis=1)

    assert jnp.allclose(attw, attw_ref, atol=2e-3, rtol=2e-3), float(
        jnp.max(jnp.abs(attw - attw_ref)))
    assert jnp.allclose(ctx, ctx_ref, atol=2e-3, rtol=2e-3), float(
        jnp.max(jnp.abs(ctx - ctx_ref)))
    print("KERNEL_OK")
</pallas_src>

<mosaic_0001>
module attributes {stable_mosaic.version = 11 : i64} {
  func.func @_attention_kernel(%arg0: i32, %arg1: memref<2x16x128xf32, #tpu.memory_space<vmem>>, %arg2: memref<1x1x128xf32, #tpu.memory_space<vmem>>, %arg3: memref<1xf32, #tpu.memory_space<smem>>, %arg4: memref<2x128xf32, #tpu.memory_space<vmem>>, %arg5: memref<2x16xf32, #tpu.memory_space<vmem>>) attributes {dimension_semantics = [#tpu.dimension_semantics<parallel>], iteration_bounds = array<i64: 1>, scalar_prefetch = 0 : i64, scratch_operands = 0 : i64, tpu.core_type = #tpu.core_type<tc>, window_params = [{transform_indices = @transform_0, window_bounds = array<i64: 2, 16, 128>}, {pipeline_mode = #tpu.pipeline_mode<synchronous>, transform_indices = @transform_1, window_bounds = array<i64: 1, 1, 128>}, {transform_indices = @transform_2, window_bounds = array<i64: 1>}, {transform_indices = @transform_3, window_bounds = array<i64: 2, 128>}, {transform_indices = @transform_4, window_bounds = array<i64: 2, 16>}]} {
    %c0 = arith.constant 0 : index
    %c0_0 = arith.constant 0 : index
    %c0_1 = arith.constant 0 : index
    %0 = vector.load %arg1[%c0, %c0_0, %c0_1] : memref<2x16x128xf32, #tpu.memory_space<vmem>>, vector<2x16x128xf32>
    %c0_2 = arith.constant 0 : index
    %c0_3 = arith.constant 0 : index
    %c0_4 = arith.constant 0 : index
    %1 = vector.load %arg2[%c0_2, %c0_3, %c0_4] : memref<1x1x128xf32, #tpu.memory_space<vmem>>, vector<1x1x128xf32>
    %c0_5 = arith.constant 0 : index
    %2 = memref.load %arg3[%c0_5] : memref<1xf32, #tpu.memory_space<smem>>
    %3 = vector.broadcast %1 : vector<1x1x128xf32> to vector<2x16x128xf32>
    %4 = arith.mulf %0, %3 : vector<2x16x128xf32>
    %cst = arith.constant dense<0.000000e+00> : vector<2x16xf32>
    %5 = vector.multi_reduction <add>, %4, %cst [2] : vector<2x16x128xf32> to vector<2x16xf32>
    %6 = vector.broadcast %2 : f32 to vector<2x16xf32>
    %7 = arith.addf %5, %6 : vector<2x16xf32>
    %cst_6 = arith.constant dense<0xFF800000> : vector<2xf32>
    %8 = vector.multi_reduction <maximumf>, %7, %cst_6 [1] : vector<2x16xf32> to vector<2xf32>
    %9 = vector.shape_cast %8 : vector<2xf32> to vector<2x1xf32>
    %10 = vector.broadcast %9 : vector<2x1xf32> to vector<2x16xf32>
    %11 = arith.subf %7, %10 : vector<2x16xf32>
    %12 = math.exp %11 : vector<2x16xf32>
    %cst_7 = arith.constant dense<0.000000e+00> : vector<2xf32>
    %13 = vector.multi_reduction <add>, %12, %cst_7 [1] : vector<2x16xf32> to vector<2xf32>
    %14 = vector.shape_cast %13 : vector<2xf32> to vector<2x1xf32>
    %15 = vector.broadcast %14 : vector<2x1xf32> to vector<2x16xf32>
    %16 = arith.divf %12, %15 : vector<2x16xf32>
    %17 = vector.shape_cast %16 : vector<2x16xf32> to vector<2x16x1xf32>
    %18 = vector.broadcast %17 : vector<2x16x1xf32> to vector<2x16x128xf32>
    %19 = arith.mulf %18, %0 : vector<2x16x128xf32>
    %cst_8 = arith.constant dense<0.000000e+00> : vector<2x128xf32>
    %20 = vector.multi_reduction <add>, %19, %cst_8 [1] : vector<2x16x128xf32> to vector<2x128xf32>
    %c0_9 = arith.constant 0 : index
    %c0_10 = arith.constant 0 : index
    %21 = vector.load %arg4[%c0_9, %c0_10] : memref<2x128xf32, #tpu.memory_space<vmem>>, vector<2x128xf32>
    tpu.vector_store %arg4[%c0_9, %c0_10], %20 {strides = array<i32>} : memref<2x128xf32, #tpu.memory_space<vmem>>, vector<2x128xf32>,
    %c0_11 = arith.constant 0 : index
    %c0_12 = arith.constant 0 : index
    %22 = vector.load %arg5[%c0_11, %c0_12] : memref<2x16xf32, #tpu.memory_space<vmem>>, vector<2x16xf32>
    tpu.vector_store %arg5[%c0_11, %c0_12], %16 {strides = array<i32>} : memref<2x16xf32, #tpu.memory_space<vmem>>, vector<2x16xf32>,
    return
  }
  func.func @transform_0(%arg0: i32) -> (i32, i32, i32) {
    %c0_i32 = arith.constant 0 : i32
    %c0_i32_0 = arith.constant 0 : i32
    %c0_i32_1 = arith.constant 0 : i32
    return %arg0, %c0_i32, %c0_i32_0 : i32, i32, i32
  }
  func.func @transform_1(%arg0: i32) -> (i32, i32, i32) {
    %c0_i32 = arith.constant 0 : i32
    %c0_i32_0 = arith.constant 0 : i32
    %c0_i32_1 = arith.constant 0 : i32
    %c0_i32_2 = arith.constant 0 : i32
    return %c0_i32, %c0_i32_0, %c0_i32_1 : i32, i32, i32
  }
  func.func @transform_2(%arg0: i32) -> i32 {
    %c0_i32 = arith.constant 0 : i32
    %c0_i32_0 = arith.constant 0 : i32
    return %c0_i32 : i32
  }
  func.func @transform_3(%arg0: i32) -> (i32, i32) {
    %c0_i32 = arith.constant 0 : i32
    %c0_i32_0 = arith.constant 0 : i32
    return %arg0, %c0_i32 : i32, i32
  }
  func.func @transform_4(%arg0: i32) -> (i32, i32) {
    %c0_i32 = arith.constant 0 : i32
    %c0_i32_0 = arith.constant 0 : i32
    return %arg0, %c0_i32 : i32, i32
  }
}

</mosaic_0001>

<bundles_post_ra>
// kernel: tpu_custom_call.1
= control target key start
LH: loop header
LB: loop body
LE: loop exit
PB: predicated region body
PF: predicated region fallthrough
CT: control target
= control target key end

     0   :  { %11 = vsyncpa [#allocation4], 0  ;;  %s451_s0 = inlined_call_operand.hbm [shape: f32[2,16,128], index: 0, kind: input, shape index: {}]   ;;  %s452_s1 = inlined_call_operand.vmem [shape: f32[1,1,128], index: 1, kind: input, shape index: {}]   ;;  %s453_s2 = inlined_call_operand.<no memory space> [shape: f32[1], index: 2, kind: input, shape index: {}]   ;;  %s454_s3 = inlined_call_operand.hbm [shape: f32[2,128], index: 3, kind: output, shape index: {0}]   ;;  %s455_s4 = inlined_call_operand.hbm [shape: f32[2,16], index: 4, kind: output, shape index: {1}]  }
   0x1   :  { %12 = vsyncpa [#allocation5], 0 }
   0x2   :  { %13 = vsyncpa [#allocation8], 0  ;;  %s354_s15 = smov [#allocation3]  }
   0x3   :  { %s19_s16 = sshll.u32 %s354_s15, 4  ;;  %s20_s16 = int_to_ptr.vmem [resolvable:$true] %s19_s16 }
   0x4   :  { %s296_s17 = scalar_lea.vmem %s20_s16, 512  ;;  %p301_p1 = scmp.lt.s32.totalorder %s20_s16, %s20_s16 }
   0x5   :  { %p297_p0 = scmp.ne.s32.totalorder %s20_s16, %s296_s17  ;;  %p302_p2 = scmp.lt.s32.totalorder %s296_s17, %s296_s17 }
   0x7   :  { %p303_p3 = por %p302_p2, %p301_p1 }
   0x9   :  { %p304_p4 = pnand %p303_p3, %p297_p0 }
   0xb   :  { %307 = shalt.err (!%p304_p4)
}
   0xc   :  { %s355_s18 = smov 128   ;;  %s356_s19 = smov 8  }
   0xd   :  { %25 = dma.hbm_to_vmem [thread:$0]  %s451_s0, 512, %s20_s16, [#allocation4], %s355_s18, %s355_s18, %s356_s19  }
   0xe   :  { %348 = dma.done.wait [#allocation4], 512  }
   0xf   :  { %349 = vsyncadd [#allocation4], 4294966784  ;;  %v388_v0 = vld [vmem:[#allocation3 + $0x10] sm:$0xff]  ;;  %v267_v1 = vld [vmem:[%s452_s1] ss:$0 sm:$0xff]  ;;  %v66_v9 = vlaneseq  ;;  %v57_v13 = vstv %s453_s2  ;;  %vm77_vm0 = vcmask 130112  }
  0x10   :  { %v393_v2 = vld [vmem:[#allocation3] sm:$0xff]  ;;  %v47_v3 = vmul.f32 %v267_v1, %v388_v0  ;;  %v397_v5 = vld [vmem:[#allocation3 + $0x18] sm:$0xff]  ;;  %v399_v6 = vld [vmem:[#allocation3 + $0x8] sm:$0xff]  ;;  %vm88_vm1 = vcmask 1041409   ;;  %vm91_vm2 = vcmask 123904   ;;  %v357_v32 = vmov 0  }
  0x11   :  { %v45_v4 = vmul.f32 %v267_v1, %v393_v2  ;;  %v48_v7 = vmul.f32 %v267_v1, %v397_v5  ;;  %v46_v8 = vmul.f32 %v267_v1, %v399_v6  ;;  %v67_v10 = vand.u32 127, %v66_v9  ;;  %275 = vset.pattern.permute.xlu0 %v357_v32  ;;  %274 = vset.pattern.permute.xlu1 %v357_v32  ;;  %s358_s2 = smov [#allocation7]  }
  0x12   :  { %53 = vadd.xlane.f32.xlu1 %v47_v3  ;;  %v403_v11 = vshrl.u32 %v66_v9, 7  ;;  %s254_s24 = sshll.u32 %s358_s2, 4  ;;  %s255_s24 = int_to_ptr.vmem [resolvable:$true] %s254_s24 }
  0x13   :  { %49 = vadd.xlane.f32.xlu0 %v45_v4  ;;  %v72_v12 = vadd.s32 4294967288, %v67_v10  ;;  %s308_s25 = scalar_lea.vmem %s255_s24, 32  ;;  %p313_p6 = scmp.lt.s32.totalorder %s255_s24, %s255_s24 }
  0x14   :  { %v409_v16 = vsub.s32 %v67_v10, %v403_v11  ;;  %v98_v33 = vsub.s32 0, %v403_v11  ;;  %v102_v34 = vsub.s32 1, %v403_v11  ;;  %p309_p5 = scmp.ne.s32.totalorder %s255_s24, %s308_s25  ;;  %p314_p7 = scmp.lt.s32.totalorder %s308_s25, %s308_s25 }
  0x15   :  { %v412_v19 = vsub.s32 %v72_v12, %v403_v11 }
  0x16   :  { %55 = vadd.xlane.f32.xlu1 %v48_v7  ;;  %p315_p8 = por %p314_p7, %p313_p6 }
  0x17   :  { %51 = vadd.xlane.f32.xlu0 %v46_v8 }
  0x18   :  { %p316_p9 = pnand %p315_p8, %p309_p5 }
  0x9b   :  { %v54_v14 = vpop.xlane.xlu1 %53 }
  0x9c   :  { %v50_v15 = vpop.xlane.xlu0 %49  ;;  %v60_v17 = vadd.f32 %v57_v13, %v54_v14 }
  0x9d   :  { %v58_v18 = vadd.f32 %v57_v13, %v50_v15 }
  0x9e   :  { %v82_v24 = vrot.slane %v60_v17, %v409_v16 }
  0x9f   :  { %v56_v20 = vpop.xlane.xlu1 %55  ;;  %v71_v25 = vrot.slane %v58_v18, %v409_v16 }
  0xa0   :  { %v52_v21 = vpop.xlane.xlu0 %51  ;;  %v61_v22 = vadd.f32 %v57_v13, %v56_v20 }
  0xa1   :  { %v59_v23 = vadd.f32 %v57_v13, %v52_v21 }
  0xa2   :  { %v86_v26 = vrot.slane %v61_v22, %v412_v19 }
  0xa3   :  { %v76_v27 = vrot.slane %v59_v23, %v412_v19 }
  0xa4   :  { %v87_v29 = vsel %vm77_vm0, %v86_v26, %v82_v24 }
  0xa5   :  { %v78_v28 = vsel %vm77_vm0, %v76_v27, %v71_v25 }
  0xa6   :  { %v89_v30 = vsel %vm88_vm1, %v87_v29, %v78_v28 }
  0xa7   :  { %v92_v31 = vsel %vm91_vm2, %v89_v30, -inf }
  0xa8   :  { %93 = vmax.xlane.f32.xlu0 %v92_v31 }
 0x131   :  { %v94_v35 = vpop.xlane.xlu0 %93 }
 0x132   :  { %v99_v36 = vrot.slane %v94_v35, %v98_v33  ;;  %v103_v37 = vrot.slane %v94_v35, %v102_v34 }
 0x134   :  { %v106_v38 = vsub.f32 %v58_v18, %v99_v36  ;;  %v107_v39 = vsub.f32 %v59_v23, %v99_v36  ;;  %v108_v40 = vsub.f32 %v60_v17, %v103_v37  ;;  %v109_v43 = vsub.f32 %v61_v22, %v103_v37 }
 0x136   :  { %v110_v41 = vmul.f32 1.442695, %v106_v38  ;;  %v112_v42 = vmul.f32 1.442695, %v107_v39  ;;  %v114_v44 = vmul.f32 1.442695, %v108_v40 }
 0x137   :  { %v116_v45 = vmul.f32 1.442695, %v109_v43 }
 0x138   :  { %276 = vpow2.f32 %v110_v41 }
 0x139   :  { %278 = vpow2.f32 %v112_v42 }
 0x13a   :  { %280 = vpow2.f32 %v114_v44 }
 0x13b   :  { %282 = vpow2.f32 %v116_v45 }
 0x145   :  { %v277_v46 = vpop.eup %276 }
 0x146   :  { %v279_v47 = vpop.eup %278  ;;  %123 = vperm.xlu1 %274, %v277_v46  }
 0x147   :  { %126 = vperm.xlu0 %275, %v279_v47   ;;  %v281_v48 = vpop.eup %280 }
 0x148   :  { %v283_v49 = vpop.eup %282 }
 0x14a   :  { %129 = vperm.xlu1 %274, %v281_v48  }
 0x14e   :  { %132 = vperm.xlu1 %274, %v283_v49  }
 0x1c1   :  { %v124_v50 = vpop.permute.xlu1 %123 }
 0x1c2   :  { %v127_v51 = vpop.permute.xlu0 %126  ;;  %v137_v54 = vrot.slane %v124_v50, %v409_v16 }
 0x1c3   :  { %v141_v53 = vrot.slane %v127_v51, %v412_v19 }
 0x1c5   :  { %v130_v52 = vpop.permute.xlu1 %129  ;;  %v142_v58 = vsel %vm77_vm0, %v141_v53, %v137_v54 }
 0x1c6   :  { %v146_v56 = vrot.slane %v130_v52, %v409_v16 }
 0x1c9   :  { %v133_v55 = vpop.permute.xlu1 %132 }
 0x1ca   :  { %v150_v57 = vrot.slane %v133_v55, %v412_v19 }
 0x1cc   :  { %v151_v59 = vsel %vm77_vm0, %v150_v57, %v146_v56 }
 0x1cd   :  { %v152_v60 = vsel %vm88_vm1, %v151_v59, %v142_v58 }
 0x1ce   :  { %v154_v61 = vsel %vm91_vm2, %v152_v60, 0.0 }
 0x1cf   :  { %155 = vadd.xlane.f32.xlu1 %v154_v61 }
 0x258   :  { %v156_v62 = vpop.xlane.xlu1 %155 }
 0x259   :  { %v161_v63 = vrot.slane %v156_v62, %v98_v33  ;;  %v165_v1 = vrot.slane %v156_v62, %v102_v34 }
 0x25b   :  { %284 = vrcp.f32 %v161_v63 }
 0x25c   :  { %286 = vrcp.f32 %v165_v1 }
 0x268   :  { %v285_v3 = vpop.eup %284 }
 0x269   :  { %v169_v4 = vmul.f32 %v285_v3, %v277_v46  ;;  %v170_v7 = vmul.f32 %v285_v3, %v279_v47  ;;  %v287_v8 = vpop.eup %286 }
 0x26a   :  { %v172_v9 = vmul.f32 %v287_v8, %v281_v48  ;;  %v173_v10 = vmul.f32 %v287_v8, %v283_v49 }
 0x26b   :  { %176 = vperm.xlu0 %275, %v169_v4  }
 0x26f   :  { %181 = vperm.xlu0 %275, %v170_v7  }
 0x273   :  { %186 = vperm.xlu0 %275, %v172_v9  }
 0x277   :  { %191 = vperm.xlu0 %275, %v173_v10  }
 0x2e6   :  { %v177_v11 = vpop.permute.xlu0 %176 }
 0x2e7   :  { %v194_v13 = vmul.f32 %v177_v11, %v393_v2  ;;  %v220_v22 = vrot.slane %v177_v11, %v409_v16 }
 0x2ea   :  { %v182_v12 = vpop.permute.xlu0 %181 }
 0x2eb   :  { %v195_v14 = vmul.f32 %v182_v12, %v399_v6  ;;  %v224_v21 = vrot.slane %v182_v12, %v412_v19 }
 0x2ed   :  { %v198_v15 = vadd.f32 %v195_v14, %v194_v13  ;;  %v225_v29 = vsel %vm77_vm0, %v224_v21, %v220_v22 }
 0x2ee   :  { %v187_v17 = vpop.permute.xlu0 %186 }
 0x2ef   :  { %v199_v18 = vrot.slane %v198_v15, 4  ;;  %v196_v24 = vmul.f32 %v187_v17, %v388_v0  ;;  %v229_v25 = vrot.slane %v187_v17, %v409_v16 }
 0x2f1   :  { %v200_v20 = vadd.f32 %v199_v18, %v198_v15 }
 0x2f2   :  { %v192_v23 = vpop.permute.xlu0 %191 }
 0x2f3   :  { %v197_v26 = vmul.f32 %v192_v23, %v397_v5  ;;  %v233_v2 = vrot.slane %v192_v23, %v412_v19  ;;  %v201_v6 = vrot.slane %v200_v20, 2 }
 0x2f5   :  { %v205_v27 = vadd.f32 %v197_v26, %v196_v24  ;;  %v234_v28 = vsel %vm77_vm0, %v233_v2, %v229_v25 }
 0x2f6   :  { %v235_v30 = vsel %vm88_vm1, %v234_v28, %v225_v29 }
 0x2f7   :  { %v206_v31 = vrot.slane %v205_v27, 4  ;;  %237 = vst.msk [vmem:[#allocation7] sm:$0x3] %vm91_vm2, %v235_v30 }
 0x2f8   :  { %319 = shalt.err (!%p316_p9)
}
 0x2f9   :  { %257 = dma.vmem_to_hbm [thread:$0]  %s255_s24, 32, %s455_s4, [#allocation8]   ;;  %v202_v0 = vadd.f32 %v201_v6, %v200_v20  ;;  %v207_v5 = vadd.f32 %v206_v31, %v205_v27 }
 0x2fa   :  { %s359_s28 = smov [#allocation6]  }
 0x2fb   :  { %v208_v16 = vrot.slane %v207_v5, 2  ;;  %v203_v32 = vrot.slane %v202_v0, 1  ;;  %s244_s29 = sshll.u32 %s359_s28, 4  ;;  %s245_s29 = int_to_ptr.vmem [resolvable:$true] %s244_s29 }
 0x2fc   :  { %s328_s30 = scalar_lea.vmem %s245_s29, 32  ;;  %p333_p11 = scmp.lt.s32.totalorder %s245_s29, %s245_s29 }
 0x2fd   :  { %v209_v19 = vadd.f32 %v208_v16, %v207_v5  ;;  %v204_v34 = vadd.f32 %v203_v32, %v202_v0  ;;  %p329_p10 = scmp.ne.s32.totalorder %s245_s29, %s328_s30  ;;  %p334_p12 = scmp.lt.s32.totalorder %s328_s30, %s328_s30 }
 0x2ff   :  { %v210_v33 = vrot.slane %v209_v19, 1  ;;  %p335_p13 = por %p334_p12, %p333_p11 }
 0x301   :  { %v211_v35 = vadd.f32 %v210_v33, %v209_v19  ;;  %p336_p0 = pnand %p335_p13, %p329_p10 }
 0x303   :  { %v214_v36 = vsel %vm88_vm1, %v211_v35, %v204_v34 }
 0x304   :  { %216 = vst [vmem:[#allocation6] sm:$0x3] %v214_v36 }
 0x305   :  { %339 = shalt.err (!%p336_p0)
}
 0x306   :  { %247 = dma.vmem_to_hbm [thread:$0]  %s245_s29, 32, %s454_s3, [#allocation5]  }
 0x307   :  { %350 = dma.done.wait [#allocation5], 32  }
 0x308   :  { %351 = vsyncadd [#allocation5], 4294967264 }
 0x309   :  { %352 = dma.done.wait [#allocation8], 32  }
 0x30a   :  { %353 = vsyncadd [#allocation8], 4294967264 }
 0x30b   :  { %264 = vsyncpa [#allocation4], 1 }
 0x30c   :  { %265 = vsyncpa [#allocation5], 1 }
 0x30d   :  { %266 = vsyncpa [#allocation8], 1 }

</bundles_post_ra>
